<compile_context>
chip_gen: v5e
topology: v5e:2x2
jax: 0.10.0
libtpu: 0.0.40
codegen_flags: <defaults>
</compile_context>

<pallas_src>
import math

import numpy as np
import jax
import jax.numpy as jnp
from jax import lax
from jax.experimental import pallas as pl
from jax.experimental.pallas import tpu as pltpu

# ---- small, self-consistent config (LlamaConfig analogue) -----------------
B = 2            # batch
S = 8            # sequence length
H = 32           # hidden_size
NUM_HEADS = 4    # num_attention_heads
HEAD_DIM = H // NUM_HEADS
FIXED_COUNT = 1              # unused on the fix_heavy_to_initial_tokens path
HEAVY_COUNT = 2              # heavy_count
RECENT_COUNT = 2             # recent_count
FIX_HEAVY_TO_INITIAL = True  # fix_heavy_to_initial_tokens
ROPE_BASE = 10000.0

BS = B * S
SCALE = 1.0 / math.sqrt(HEAD_DIM)


def _rotate_half(x):
    d = x.shape[-1]
    return jnp.concatenate([-x[..., d // 2:], x[..., : d // 2]], axis=-1)


# ---------------------------- Pallas kernel --------------------------------
def attention_kernel(x_ref, wqkv_ref, wo_ref, cos_ref, sin_ref, rot_ref, mask_ref,
                     o_ref, ctx_ref):
    x = x_ref[...]                                   # (BS, H) flattened batch*seq
    cos = cos_ref[...]                               # (BS, H) tiled across heads
    sin = sin_ref[...]
    rot = rot_ref[...]                               # (H, H) block-diag rotate_half

    # Fused QKV projection: one MXU contraction instead of three.
    qkv = jnp.dot(x, wqkv_ref[...], preferred_element_type=jnp.float32)  # (BS, 3H)
    q = qkv[:, 0 * H:1 * H]
    k = qkv[:, 1 * H:2 * H]
    v = qkv[:, 2 * H:3 * H]

    # Full-width RoPE across all heads:
    #   rotate_half per head-block == q @ rot (block-diagonal +/-1 matrix, MXU),
    #   then whole-vreg VPU muls/adds -- no per-head lane slicing.
    q = q * cos + jnp.dot(q, rot, preferred_element_type=jnp.float32) * sin
    k = k * cos + jnp.dot(k, rot, preferred_element_type=jnp.float32) * sin

    # Precomputed mask: batch-blocked & causal & (heavy-initial | recent-window).
    allowed = mask_ref[...] > 0.5                    # (BS, BS) bool

    # Per-head attention, all batches at once.  Cross-batch scores are masked
    # to -999 and underflow to exactly 0.0 after the max-subtracted exp, so
    # they contribute nothing to the softmax denominator or to P @ V.
    for h in range(NUM_HEADS):
        lo = h * HEAD_DIM
        qh = q[:, lo:lo + HEAD_DIM]                  # (BS, D)
        kh = k[:, lo:lo + HEAD_DIM]
        vh = v[:, lo:lo + HEAD_DIM]

        # q @ k^T without an in-kernel transpose.
        s = lax.dot_general(qh, kh, (((1,), (1,)), ((), ())),
                            preferred_element_type=jnp.float32) * SCALE   # (BS, BS)
        # attn_weights[~mask_bottom] = -999   (set, not add -- matches PyTorch)
        s = jnp.where(allowed, s, jnp.float32(-999.0))

        # softmax in fp32 (exact division to keep 1e-5 parity with reference)
        s = s - jnp.max(s, axis=-1, keepdims=True)
        p = jnp.exp(s)
        p = p / jnp.sum(p, axis=-1, keepdims=True)

        # Write this head's PV result straight into the ctx scratch lanes
        # (no concatenate / relayout before the output projection).
        ctx_ref[:, lo:lo + HEAD_DIM] = jnp.dot(p, vh,
                                               preferred_element_type=jnp.float32)

    # Output projection (weight pre-transposed in the wrapper).
    o_ref[...] = jnp.dot(ctx_ref[...], wo_ref[...],
                         preferred_element_type=jnp.float32)


# ------------------------------- wrapper ------------------------------------
def llama_attention_sparse(x, wq, wk, wv, wo, cos, sin):
    # All of the prep below is cheap wrapper-side XLA work (weight reshuffles,
    # constant masks); the kernel itself runs once with no grid.
    x2d = x.reshape(BS, H)
    w_qkv_t = jnp.concatenate([wq, wk, wv], axis=0).T        # (H, 3H) pre-transposed
    wo_t = wo.T                                              # (H, H)  pre-transposed
    cos_full = jnp.tile(cos, (B, NUM_HEADS))                 # (BS, H)
    sin_full = jnp.tile(sin, (B, NUM_HEADS))                 # (BS, H)

    # Block-diagonal rotate_half matrix: q_rot = q @ rot.
    rot_np = np.zeros((H, H), dtype=np.float32)
    half = HEAD_DIM // 2
    for h in range(NUM_HEADS):
        b0 = h * HEAD_DIM
        for p in range(half):
            rot_np[b0 + p + half, b0 + p] = -1.0             # first half <- -x[D/2:]
            rot_np[b0 + p, b0 + p + half] = 1.0              # second half <- x[:D/2]
    rot = jnp.asarray(rot_np)

    # Sparse mask, precomputed once: allowed = same_batch & causal &
    # (heavy-initial | recent-window).  1.0 = keep score, 0.0 = set to -999.
    gi = np.arange(BS)
    r = gi % S
    b = gi // S
    row_r, col_r = r[:, None], r[None, :]
    same_b = b[:, None] == b[None, :]
    if FIX_HEAVY_TO_INITIAL and HEAVY_COUNT > 0:
        heavy = np.broadcast_to(col_r < HEAVY_COUNT, (BS, BS))
    else:
        heavy = np.zeros((BS, BS), dtype=bool)
        # TODO(synk): local_heavy_hitter_mask_nonoverlap is not defined in the
        # reference source; only the fix_heavy_to_initial_tokens branch is implemented.
    recent = col_r >= (row_r - RECENT_COUNT)
    allowed = same_b & (heavy | recent) & (col_r <= row_r)
    mask = jnp.asarray(allowed.astype(np.float32))           # (BS, BS)

    out2d = pl.pallas_call(
        attention_kernel,
        out_shape=jax.ShapeDtypeStruct((BS, H), jnp.float32),
        scratch_shapes=[pltpu.VMEM((BS, H), jnp.float32)],   # ctx buffer
    )(x2d, w_qkv_t, wo_t, cos_full, sin_full, rot, mask)
    return out2d.reshape(B, S, H)


# ---------------------------- pure-JAX reference ----------------------------
def reference(x, wq, wk, wv, wo, cos, sin):
    q = x @ wq.T
    k = x @ wk.T
    v = x @ wv.T

    def split(t):
        return t.reshape(B, S, NUM_HEADS, HEAD_DIM).transpose(0, 2, 1, 3)

    q, k, v = split(q), split(k), split(v)
    cosb, sinb = cos[None, None], sin[None, None]
    q = q * cosb + _rotate_half(q) * sinb
    k = k * cosb + _rotate_half(k) * sinb

    s = jnp.einsum('bhqd,bhkd->bhqk', q, k) / math.sqrt(HEAD_DIM)
    row = jnp.arange(S)[:, None]
    col = jnp.arange(S)[None, :]
    if FIX_HEAVY_TO_INITIAL and HEAVY_COUNT > 0:
        heavy = col < HEAVY_COUNT
    else:
        heavy = jnp.zeros((S, S), dtype=bool)
    allowed = (heavy | (col >= row - RECENT_COUNT)) & (col <= row)
    s = jnp.where(allowed[None, None], s, -999.0)
    p = jax.nn.softmax(s, axis=-1)
    out = jnp.einsum('bhqk,bhkd->bhqd', p, v)
    out = out.transpose(0, 2, 1, 3).reshape(B, S, H)
    return out @ wo.T


if __name__ == "__main__":
    key = jax.random.PRNGKey(0)
    kx, kq, kk, kv, ko = jax.random.split(key, 5)

    x = jax.random.normal(kx, (B, S, H), dtype=jnp.float32)
    scale = 0.05
    wq = jax.random.normal(kq, (H, H), dtype=jnp.float32) * scale
    wk = jax.random.normal(kk, (H, H), dtype=jnp.float32) * scale
    wv = jax.random.normal(kv, (H, H), dtype=jnp.float32) * scale
    wo = jax.random.normal(ko, (H, H), dtype=jnp.float32) * scale

    # LlamaRotaryEmbedding: cos/sin of shape (S, HEAD_DIM), position_ids = arange(S)
    inv_freq = 1.0 / (ROPE_BASE ** (jnp.arange(0, HEAD_DIM, 2, dtype=jnp.float32) / HEAD_DIM))
    pos = jnp.arange(S, dtype=jnp.float32)
    freqs = pos[:, None] * inv_freq[None, :]          # (S, HEAD_DIM/2)
    emb = jnp.concatenate([freqs, freqs], axis=-1)    # (S, HEAD_DIM)
    cos = jnp.cos(emb)
    sin = jnp.sin(emb)

    out = llama_attention_sparse(x, wq, wk, wv, wo, cos, sin)
    out = jax.block_until_ready(out)

    ref = reference(x, wq, wk, wv, wo, cos, sin)
    assert out.shape == (B, S, H)
    assert jnp.allclose(out, ref, rtol=1e-5, atol=1e-5), "mismatch vs reference"
    print("KERNEL_OK")
</pallas_src>

<mosaic_0001>
module attributes {stable_mosaic.version = 11 : i64} {
  func.func @attention_kernel(%arg0: memref<16x32xf32, #tpu.memory_space<vmem>>, %arg1: memref<32x96xf32, #tpu.memory_space<vmem>>, %arg2: memref<32x32xf32, #tpu.memory_space<vmem>>, %arg3: memref<16x32xf32, #tpu.memory_space<vmem>>, %arg4: memref<16x32xf32, #tpu.memory_space<vmem>>, %arg5: memref<32x32xf32, #tpu.memory_space<vmem>>, %arg6: memref<16x16xf32, #tpu.memory_space<vmem>>, %arg7: memref<16x32xf32, #tpu.memory_space<vmem>>, %arg8: memref<16x32xf32, #tpu.memory_space<vmem>>) attributes {dimension_semantics = [], scalar_prefetch = 0 : i64, scratch_operands = 1 : i64, tpu.core_type = #tpu.core_type<tc>} {
    %c0 = arith.constant 0 : index
    %c0_0 = arith.constant 0 : index
    %0 = vector.load %arg0[%c0, %c0_0] : memref<16x32xf32, #tpu.memory_space<vmem>>, vector<16x32xf32>
    %c0_1 = arith.constant 0 : index
    %c0_2 = arith.constant 0 : index
    %1 = vector.load %arg3[%c0_1, %c0_2] : memref<16x32xf32, #tpu.memory_space<vmem>>, vector<16x32xf32>
    %c0_3 = arith.constant 0 : index
    %c0_4 = arith.constant 0 : index
    %2 = vector.load %arg4[%c0_3, %c0_4] : memref<16x32xf32, #tpu.memory_space<vmem>>, vector<16x32xf32>
    %c0_5 = arith.constant 0 : index
    %c0_6 = arith.constant 0 : index
    %3 = vector.load %arg5[%c0_5, %c0_6] : memref<32x32xf32, #tpu.memory_space<vmem>>, vector<32x32xf32>
    %c0_7 = arith.constant 0 : index
    %c0_8 = arith.constant 0 : index
    %4 = vector.load %arg1[%c0_7, %c0_8] : memref<32x96xf32, #tpu.memory_space<vmem>>, vector<32x96xf32>
    %cst = arith.constant dense<0.000000e+00> : vector<16x96xf32>
    %5 = tpu.matmul %0, %4, %cst {dimension_numbers = #tpu.dot_dimension_numbers<[1], [0], [0], [1], [0, 0, 1, 1], [], []>} : vector<16x32xf32>, vector<32x96xf32>, vector<16x96xf32> -> vector<16x96xf32>
    %6 = vector.extract_strided_slice %5 {offsets = [0, 0], sizes = [16, 32], strides = [1, 1]} : vector<16x96xf32> to vector<16x32xf32>
    %7 = vector.extract_strided_slice %5 {offsets = [0, 32], sizes = [16, 32], strides = [1, 1]} : vector<16x96xf32> to vector<16x32xf32>
    %8 = vector.extract_strided_slice %5 {offsets = [0, 64], sizes = [16, 32], strides = [1, 1]} : vector<16x96xf32> to vector<16x32xf32>
    %9 = arith.mulf %6, %1 : vector<16x32xf32>
    %cst_9 = arith.constant dense<0.000000e+00> : vector<16x32xf32>
    %10 = tpu.matmul %6, %3, %cst_9 {dimension_numbers = #tpu.dot_dimension_numbers<[1], [0], [0], [1], [0, 0, 1, 1], [], []>} : vector<16x32xf32>, vector<32x32xf32>, vector<16x32xf32> -> vector<16x32xf32>
    %11 = arith.mulf %10, %2 : vector<16x32xf32>
    %12 = arith.addf %9, %11 : vector<16x32xf32>
    %13 = arith.mulf %7, %1 : vector<16x32xf32>
    %cst_10 = arith.constant dense<0.000000e+00> : vector<16x32xf32>
    %14 = tpu.matmul %7, %3, %cst_10 {dimension_numbers = #tpu.dot_dimension_numbers<[1], [0], [0], [1], [0, 0, 1, 1], [], []>} : vector<16x32xf32>, vector<32x32xf32>, vector<16x32xf32> -> vector<16x32xf32>
    %15 = arith.mulf %14, %2 : vector<16x32xf32>
    %16 = arith.addf %13, %15 : vector<16x32xf32>
    %c0_11 = arith.constant 0 : index
    %c0_12 = arith.constant 0 : index
    %17 = vector.load %arg6[%c0_11, %c0_12] : memref<16x16xf32, #tpu.memory_space<vmem>>, vector<16x16xf32>
    %cst_13 = arith.constant 5.000000e-01 : f32
    %18 = vector.broadcast %cst_13 : f32 to vector<16x16xf32>
    %19 = arith.cmpf ogt, %17, %18 : vector<16x16xf32>
    %20 = vector.extract_strided_slice %12 {offsets = [0, 0], sizes = [16, 8], strides = [1, 1]} : vector<16x32xf32> to vector<16x8xf32>
    %21 = vector.extract_strided_slice %16 {offsets = [0, 0], sizes = [16, 8], strides = [1, 1]} : vector<16x32xf32> to vector<16x8xf32>
    %22 = vector.extract_strided_slice %8 {offsets = [0, 0], sizes = [16, 8], strides = [1, 1]} : vector<16x32xf32> to vector<16x8xf32>
    %cst_14 = arith.constant dense<0.000000e+00> : vector<16x16xf32>
    %23 = tpu.matmul %20, %21, %cst_14 {dimension_numbers = #tpu.dot_dimension_numbers<[1], [1], [0], [0], [0, 0, 1, 0], [], []>} : vector<16x8xf32>, vector<16x8xf32>, vector<16x16xf32> -> vector<16x16xf32>
    %cst_15 = arith.constant 0.353553385 : f32
    %24 = vector.broadcast %cst_15 : f32 to vector<16x16xf32>
    %25 = arith.mulf %23, %24 : vector<16x16xf32>
    %cst_16 = arith.constant -9.990000e+02 : f32
    %26 = vector.broadcast %cst_16 : f32 to vector<16x16xf32>
    %27 = arith.select %19, %25, %26 : vector<16x16xi1>, vector<16x16xf32>
    %cst_17 = arith.constant dense<0xFF800000> : vector<16xf32>
    %28 = vector.multi_reduction <maximumf>, %27, %cst_17 [1] : vector<16x16xf32> to vector<16xf32>
    %29 = vector.shape_cast %28 : vector<16xf32> to vector<16x1xf32>
    %30 = vector.broadcast %29 : vector<16x1xf32> to vector<16x16xf32>
    %31 = arith.subf %27, %30 : vector<16x16xf32>
    %32 = math.exp %31 : vector<16x16xf32>
    %cst_18 = arith.constant dense<0.000000e+00> : vector<16xf32>
    %33 = vector.multi_reduction <add>, %32, %cst_18 [1] : vector<16x16xf32> to vector<16xf32>
    %34 = vector.shape_cast %33 : vector<16xf32> to vector<16x1xf32>
    %35 = vector.broadcast %34 : vector<16x1xf32> to vector<16x16xf32>
    %36 = arith.divf %32, %35 : vector<16x16xf32>
    %cst_19 = arith.constant dense<0.000000e+00> : vector<16x8xf32>
    %37 = tpu.matmul %36, %22, %cst_19 {dimension_numbers = #tpu.dot_dimension_numbers<[1], [0], [0], [1], [0, 0, 1, 1], [], []>} : vector<16x16xf32>, vector<16x8xf32>, vector<16x8xf32> -> vector<16x8xf32>
    %c0_20 = arith.constant 0 : index
    %c0_21 = arith.constant 0 : index
    %38 = vector.load %arg8[%c0_20, %c0_21] : memref<16x32xf32, #tpu.memory_space<vmem>>, vector<16x8xf32>
    tpu.vector_store %arg8[%c0_20, %c0_21], %37 {strides = array<i32>} : memref<16x32xf32, #tpu.memory_space<vmem>>, vector<16x8xf32>,
    %39 = vector.extract_strided_slice %12 {offsets = [0, 8], sizes = [16, 8], strides = [1, 1]} : vector<16x32xf32> to vector<16x8xf32>
    %40 = vector.extract_strided_slice %16 {offsets = [0, 8], sizes = [16, 8], strides = [1, 1]} : vector<16x32xf32> to vector<16x8xf32>
    %41 = vector.extract_strided_slice %8 {offsets = [0, 8], sizes = [16, 8], strides = [1, 1]} : vector<16x32xf32> to vector<16x8xf32>
    %cst_22 = arith.constant dense<0.000000e+00> : vector<16x16xf32>
    %42 = tpu.matmul %39, %40, %cst_22 {dimension_numbers = #tpu.dot_dimension_numbers<[1], [1], [0], [0], [0, 0, 1, 0], [], []>} : vector<16x8xf32>, vector<16x8xf32>, vector<16x16xf32> -> vector<16x16xf32>
    %cst_23 = arith.constant 0.353553385 : f32
    %43 = vector.broadcast %cst_23 : f32 to vector<16x16xf32>
    %44 = arith.mulf %42, %43 : vector<16x16xf32>
    %cst_24 = arith.constant -9.990000e+02 : f32
    %45 = vector.broadcast %cst_24 : f32 to vector<16x16xf32>
    %46 = arith.select %19, %44, %45 : vector<16x16xi1>, vector<16x16xf32>
    %cst_25 = arith.constant dense<0xFF800000> : vector<16xf32>
    %47 = vector.multi_reduction <maximumf>, %46, %cst_25 [1] : vector<16x16xf32> to vector<16xf32>
    %48 = vector.shape_cast %47 : vector<16xf32> to vector<16x1xf32>
    %49 = vector.broadcast %48 : vector<16x1xf32> to vector<16x16xf32>
    %50 = arith.subf %46, %49 : vector<16x16xf32>
    %51 = math.exp %50 : vector<16x16xf32>
    %cst_26 = arith.constant dense<0.000000e+00> : vector<16xf32>
    %52 = vector.multi_reduction <add>, %51, %cst_26 [1] : vector<16x16xf32> to vector<16xf32>
    %53 = vector.shape_cast %52 : vector<16xf32> to vector<16x1xf32>
    %54 = vector.broadcast %53 : vector<16x1xf32> to vector<16x16xf32>
    %55 = arith.divf %51, %54 : vector<16x16xf32>
    %cst_27 = arith.constant dense<0.000000e+00> : vector<16x8xf32>
    %56 = tpu.matmul %55, %41, %cst_27 {dimension_numbers = #tpu.dot_dimension_numbers<[1], [0], [0], [1], [0, 0, 1, 1], [], []>} : vector<16x16xf32>, vector<16x8xf32>, vector<16x8xf32> -> vector<16x8xf32>
    %c0_28 = arith.constant 0 : index
    %c8 = arith.constant 8 : index
    %57 = vector.load %arg8[%c0_28, %c8] : memref<16x32xf32, #tpu.memory_space<vmem>>, vector<16x8xf32>
    tpu.vector_store %arg8[%c0_28, %c8], %56 {strides = array<i32>} : memref<16x32xf32, #tpu.memory_space<vmem>>, vector<16x8xf32>,
    %58 = vector.extract_strided_slice %12 {offsets = [0, 16], sizes = [16, 8], strides = [1, 1]} : vector<16x32xf32> to vector<16x8xf32>
    %59 = vector.extract_strided_slice %16 {offsets = [0, 16], sizes = [16, 8], strides = [1, 1]} : vector<16x32xf32> to vector<16x8xf32>
    %60 = vector.extract_strided_slice %8 {offsets = [0, 16], sizes = [16, 8], strides = [1, 1]} : vector<16x32xf32> to vector<16x8xf32>
    %cst_29 = arith.constant dense<0.000000e+00> : vector<16x16xf32>
    %61 = tpu.matmul %58, %59, %cst_29 {dimension_numbers = #tpu.dot_dimension_numbers<[1], [1], [0], [0], [0, 0, 1, 0], [], []>} : vector<16x8xf32>, vector<16x8xf32>, vector<16x16xf32> -> vector<16x16xf32>
    %cst_30 = arith.constant 0.353553385 : f32
    %62 = vector.broadcast %cst_30 : f32 to vector<16x16xf32>
    %63 = arith.mulf %61, %62 : vector<16x16xf32>
    %cst_31 = arith.constant -9.990000e+02 : f32
    %64 = vector.broadcast %cst_31 : f32 to vector<16x16xf32>
    %65 = arith.select %19, %63, %64 : vector<16x16xi1>, vector<16x16xf32>
    %cst_32 = arith.constant dense<0xFF800000> : vector<16xf32>
    %66 = vector.multi_reduction <maximumf>, %65, %cst_32 [1] : vector<16x16xf32> to vector<16xf32>
    %67 = vector.shape_cast %66 : vector<16xf32> to vector<16x1xf32>
    %68 = vector.broadcast %67 : vector<16x1xf32> to vector<16x16xf32>
    %69 = arith.subf %65, %68 : vector<16x16xf32>
    %70 = math.exp %69 : vector<16x16xf32>
    %cst_33 = arith.constant dense<0.000000e+00> : vector<16xf32>
    %71 = vector.multi_reduction <add>, %70, %cst_33 [1] : vector<16x16xf32> to vector<16xf32>
    %72 = vector.shape_cast %71 : vector<16xf32> to vector<16x1xf32>
    %73 = vector.broadcast %72 : vector<16x1xf32> to vector<16x16xf32>
    %74 = arith.divf %70, %73 : vector<16x16xf32>
    %cst_34 = arith.constant dense<0.000000e+00> : vector<16x8xf32>
    %75 = tpu.matmul %74, %60, %cst_34 {dimension_numbers = #tpu.dot_dimension_numbers<[1], [0], [0], [1], [0, 0, 1, 1], [], []>} : vector<16x16xf32>, vector<16x8xf32>, vector<16x8xf32> -> vector<16x8xf32>
    %c0_35 = arith.constant 0 : index
    %c16 = arith.constant 16 : index
    %76 = vector.load %arg8[%c0_35, %c16] : memref<16x32xf32, #tpu.memory_space<vmem>>, vector<16x8xf32>
    tpu.vector_store %arg8[%c0_35, %c16], %75 {strides = array<i32>} : memref<16x32xf32, #tpu.memory_space<vmem>>, vector<16x8xf32>,
    %77 = vector.extract_strided_slice %12 {offsets = [0, 24], sizes = [16, 8], strides = [1, 1]} : vector<16x32xf32> to vector<16x8xf32>
    %78 = vector.extract_strided_slice %16 {offsets = [0, 24], sizes = [16, 8], strides = [1, 1]} : vector<16x32xf32> to vector<16x8xf32>
    %79 = vector.extract_strided_slice %8 {offsets = [0, 24], sizes = [16, 8], strides = [1, 1]} : vector<16x32xf32> to vector<16x8xf32>
    %cst_36 = arith.constant dense<0.000000e+00> : vector<16x16xf32>
    %80 = tpu.matmul %77, %78, %cst_36 {dimension_numbers = #tpu.dot_dimension_numbers<[1], [1], [0], [0], [0, 0, 1, 0], [], []>} : vector<16x8xf32>, vector<16x8xf32>, vector<16x16xf32> -> vector<16x16xf32>
    %cst_37 = arith.constant 0.353553385 : f32
    %81 = vector.broadcast %cst_37 : f32 to vector<16x16xf32>
    %82 = arith.mulf %80, %81 : vector<16x16xf32>
    %cst_38 = arith.constant -9.990000e+02 : f32
    %83 = vector.broadcast %cst_38 : f32 to vector<16x16xf32>
    %84 = arith.select %19, %82, %83 : vector<16x16xi1>, vector<16x16xf32>
    %cst_39 = arith.constant dense<0xFF800000> : vector<16xf32>
    %85 = vector.multi_reduction <maximumf>, %84, %cst_39 [1] : vector<16x16xf32> to vector<16xf32>
    %86 = vector.shape_cast %85 : vector<16xf32> to vector<16x1xf32>
    %87 = vector.broadcast %86 : vector<16x1xf32> to vector<16x16xf32>
    %88 = arith.subf %84, %87 : vector<16x16xf32>
    %89 = math.exp %88 : vector<16x16xf32>
    %cst_40 = arith.constant dense<0.000000e+00> : vector<16xf32>
    %90 = vector.multi_reduction <add>, %89, %cst_40 [1] : vector<16x16xf32> to vector<16xf32>
    %91 = vector.shape_cast %90 : vector<16xf32> to vector<16x1xf32>
    %92 = vector.broadcast %91 : vector<16x1xf32> to vector<16x16xf32>
    %93 = arith.divf %89, %92 : vector<16x16xf32>
    %cst_41 = arith.constant dense<0.000000e+00> : vector<16x8xf32>
    %94 = tpu.matmul %93, %79, %cst_41 {dimension_numbers = #tpu.dot_dimension_numbers<[1], [0], [0], [1], [0, 0, 1, 1], [], []>} : vector<16x16xf32>, vector<16x8xf32>, vector<16x8xf32> -> vector<16x8xf32>
    %c0_42 = arith.constant 0 : index
    %c24 = arith.constant 24 : index
    %95 = vector.load %arg8[%c0_42, %c24] : memref<16x32xf32, #tpu.memory_space<vmem>>, vector<16x8xf32>
    tpu.vector_store %arg8[%c0_42, %c24], %94 {strides = array<i32>} : memref<16x32xf32, #tpu.memory_space<vmem>>, vector<16x8xf32>,
    %c0_43 = arith.constant 0 : index
    %c0_44 = arith.constant 0 : index
    %96 = vector.load %arg8[%c0_43, %c0_44] : memref<16x32xf32, #tpu.memory_space<vmem>>, vector<16x32xf32>
    %c0_45 = arith.constant 0 : index
    %c0_46 = arith.constant 0 : index
    %97 = vector.load %arg2[%c0_45, %c0_46] : memref<32x32xf32, #tpu.memory_space<vmem>>, vector<32x32xf32>
    %cst_47 = arith.constant dense<0.000000e+00> : vector<16x32xf32>
    %98 = tpu.matmul %96, %97, %cst_47 {dimension_numbers = #tpu.dot_dimension_numbers<[1], [0], [0], [1], [0, 0, 1, 1], [], []>} : vector<16x32xf32>, vector<32x32xf32>, vector<16x32xf32> -> vector<16x32xf32>
    %c0_48 = arith.constant 0 : index
    %c0_49 = arith.constant 0 : index
    %99 = vector.load %arg7[%c0_48, %c0_49] : memref<16x32xf32, #tpu.memory_space<vmem>>, vector<16x32xf32>
    tpu.vector_store %arg7[%c0_48, %c0_49], %98 {strides = array<i32>} : memref<16x32xf32, #tpu.memory_space<vmem>>, vector<16x32xf32>,
    return
  }
}

</mosaic_0001>

<bundles_post_ra>
// kernel: tpu_custom_call.1
= control target key start
LH: loop header
LB: loop body
LE: loop exit
PB: predicated region body
PF: predicated region fallthrough
CT: control target
= control target key end

     0   :  { %12 = vsyncpa [#allocation4], 0  ;;  %s1471_s0 = inlined_call_operand.hbm [shape: f32[16,32], index: 0, kind: input, shape index: {}]   ;;  %s1472_s1 = inlined_call_operand.hbm [shape: f32[32,96], index: 1, kind: input, shape index: {}]   ;;  %s1473_s2 = inlined_call_operand.hbm [shape: f32[32,32], index: 2, kind: input, shape index: {}]   ;;  %s1474_s3 = inlined_call_operand.hbm [shape: f32[16,32], index: 3, kind: input, shape index: {}]   ;;  %s1475_s4 = inlined_call_operand.hbm [shape: f32[16,32], index: 4, kind: input, shape index: {}]   ;;  %s1476_s5 = inlined_call_operand.hbm [shape: f32[32,32], index: 5, kind: input, shape index: {}]   ;;  %s1477_s6 = inlined_call_operand.hbm [shape: f32[16,16], index: 6, kind: input, shape index: {}]   ;;  %s1478_s7 = inlined_call_operand.hbm [shape: f32[16,32], index: 7, kind: output, shape index: {}]  }
   0x1   :  { %13 = vsyncpa [#allocation7], 0 }
   0x2   :  { %14 = vsyncpa [#allocation10], 0 }
   0x3   :  { %15 = vsyncpa [#allocation13], 0 }
   0x4   :  { %16 = vsyncpa [#allocation5], 0  ;;  %s34_s26 = sshll.u32 %s1472_s1, 4  ;;  %s1182_s27 = smov [#allocation6]   ;;  %s35_s26 = int_to_ptr.hbm [resolvable:$true] %s34_s26 }
   0x5   :  { %s36_s28 = sshll.u32 %s1182_s27, 4  ;;  %s60_s8 = sshll.u32 %s1474_s3, 4  ;;  %s37_s28 = int_to_ptr.vmem [resolvable:$true] %s36_s28  ;;  %s61_s8 = int_to_ptr.hbm [resolvable:$true] %s60_s8 }
   0x6   :  { %s1183_s9 = smov 128   ;;  %s1184_s10 = smov 8  }
   0x7   :  { %42 = dma.hbm_to_vmem [thread:$0]  %s35_s26, 512, %s37_s28, [#allocation7], %s1183_s9, %s1183_s9, %s1184_s10  }
   0x8   :  { %s1185_s11 = smov [#allocation9]   ;;  %s86_s1 = sshll.u32 %s1476_s5, 4  ;;  %s87_s1 = int_to_ptr.hbm [resolvable:$true] %s86_s1 }
   0x9   :  { %s62_s12 = sshll.u32 %s1185_s11, 4  ;;  %s21_s16 = sshll.u32 %s1471_s0, 4  ;;  %s63_s12 = int_to_ptr.vmem [resolvable:$true] %s62_s12  ;;  %s22_s16 = int_to_ptr.hbm [resolvable:$true] %s21_s16 }
   0xa   :  { %68 = dma.hbm_to_vmem [thread:$0]  %s61_s8, 256, %s63_s12, [#allocation10], %s1183_s9, %s1183_s9, %s1184_s10  }
   0xb   :  { %s1186_s17 = smov [#allocation12]   ;;  %s1187_s19 = smov [#allocation3]  }
   0xc   :  { %s88_s18 = sshll.u32 %s1186_s17, 4  ;;  %s23_s5 = sshll.u32 %s1187_s19, 4  ;;  %s89_s18 = int_to_ptr.vmem [resolvable:$true] %s88_s18  ;;  %s24_s5 = int_to_ptr.vmem [resolvable:$true] %s23_s5 }
   0xd   :  { %94 = dma.hbm_to_vmem [thread:$0]  %s87_s1, 512, %s89_s18, [#allocation13], %s1183_s9, %s1183_s9, %s1184_s10  }
   0xe   :  { %s47_s22 = sshll.u32 %s1473_s2, 4  ;;  %s73_s24 = sshll.u32 %s1475_s4, 4  ;;  %s48_s22 = int_to_ptr.hbm [resolvable:$true] %s47_s22  ;;  %s74_s24 = int_to_ptr.hbm [resolvable:$true] %s73_s24 }
   0xf   :  { %29 = dma.hbm_to_vmem [thread:$0]  %s22_s16, 256, %s24_s5, [#allocation4], %s1183_s9, %s1183_s9, %s1184_s10  }
  0x10   :  { %s1188_s25 = smov [#allocation8]   ;;  %s1189_s27 = smov [#allocation11]  }
  0x11   :  { %s49_s26 = sshll.u32 %s1188_s25, 4  ;;  %s75_s2 = sshll.u32 %s1189_s27, 4  ;;  %s50_s26 = int_to_ptr.vmem [resolvable:$true] %s49_s26  ;;  %s76_s2 = int_to_ptr.vmem [resolvable:$true] %s75_s2 }
  0x12   :  { %55 = dma.hbm_to_vmem [thread:$0]  %s48_s22, 512, %s50_s26, [#allocation7], %s1183_s9, %s1183_s9, %s1184_s10  }
  0x13   :  { %s99_s30 = sshll.u32 %s1477_s6, 4  ;;  %s1190_s4 = smov [#allocation14]   ;;  %s100_s30 = int_to_ptr.hbm [resolvable:$true] %s99_s30 }
  0x14   :  { %81 = dma.hbm_to_vmem [thread:$0]  %s74_s24, 256, %s76_s2, [#allocation10], %s1183_s9, %s1183_s9, %s1184_s10  }
  0x15   :  { %s101_s8 = sshll.u32 %s1190_s4, 4  ;;  %s102_s8 = int_to_ptr.vmem [resolvable:$true] %s101_s8 }
  0x16   :  { %107 = dma.hbm_to_vmem [thread:$0]  %s100_s30, 256, %s102_s8, [#allocation13], %s1183_s9, %s1183_s9, %s1184_s10  }
  0x17   :  { %1172 = dma.done.wait [#allocation4], 256  }
  0x18   :  { %1173 = vsyncadd [#allocation4], 4294967040 }
  0x19   :  { %1174 = dma.done.wait [#allocation7], 1024  }
  0x1a   :  { %1175 = vsyncadd [#allocation7], 4294966272 }
  0x1b   :  { %1176 = dma.done.wait [#allocation10], 512  }
  0x1c   :  { %1177 = vsyncadd [#allocation10], 4294966784 }
  0x1d   :  { %1178 = dma.done.wait [#allocation13], 768  }
  0x1e   :  { %1179 = vsyncadd [#allocation13], 4294966528  ;;  %v149_v0 = vld [vmem:[#allocation6 + $0x18] sm:$0xff]  ;;  %v148_v1 = vld [vmem:[#allocation6 + $0x10] sm:$0xff]  ;;  %s1191_s6 = smov 32   ;;  %vm150_vm0 = vcmask 261120  }
  0x1f   :  { %169 = vmatpush.msra.mxu0 %v149_v0  ;;  %v147_v2 = vld [vmem:[#allocation6 + $0x8] sm:$0xff]  ;;  %v138_v4 = vld [vmem:[#allocation9] sm:$0xff]  ;;  %v145_v5 = vld [vmem:[#allocation12 + $0x18] sm:$0xff]  ;;  %s1192_s11 = smov 96   ;;  %s1193_s12 = smov 120   ;;  %vm278_vm1 = vcmask 64512  }
  0x20   :  { %v139_v3 = vld [vmem:[#allocation9 + $0x8] sm:$0xff]  ;;  %v144_v6 = vld [vmem:[#allocation12 + $0x10] sm:$0xff]  ;;  %v146_v7 = vld [vmem:[#allocation6] sm:$0xff]  ;;  %217 = vrot.lane.b32.xlu2 %v138_v4, %s1191_s6  ;;  %200 = vmatpush.msra.mxu1 %v145_v5  ;;  %s1194_s13 = smov 80   ;;  %s1195_s14 = smov 104   ;;  %vm316_vm3 = vcmask 130048  }
  0x21   :  { %170 = vmatpush.msra.mxu0 %v148_v1  ;;  %219 = vrot.lane.b32.xlu1 %v139_v3, %s1191_s6  ;;  %v136_v8 = vld [vmem:[#allocation3] sm:$0xff]  ;;  %v143_v9 = vld [vmem:[#allocation12 + $0x8] sm:$0xff]  ;;  %v142_v10 = vld [vmem:[#allocation12] sm:$0xff]  ;;  %s1196_s1 = smov 88   ;;  %s1197_s3 = smov 72  }
  0x22   :  { %245 = vmatpush.msra.mxu2 %v145_v5  ;;  %201 = vmatpush.msra.mxu1 %v144_v6  ;;  %v137_v11 = vld [vmem:[#allocation3 + $0x8] sm:$0xff]  ;;  %v140_v16 = vld [vmem:[#allocation11] sm:$0xff]  ;;  %s1198_s15 = smov 112   ;;  %v268_v52 = vld [vmem:[#allocation14] sm:$0xff]  ;;  %s1199_s16 = smov 56  }
  0x23   :  { %171 = vmatpush.msra.mxu0 %v147_v2  ;;  %v141_v19 = vld [vmem:[#allocation11 + $0x8] sm:$0xff]  ;;  %vm270_vm2 = vcmp.gt.f32.partialorder %v268_v52, 0.5  ;;  %v269_v60 = vld [vmem:[#allocation14 + $0x8] sm:$0xff]  ;;  %s1200_s17 = smov 40   ;;  %s1201_s18 = smov 64  }
  0x24   :  { %246 = vmatpush.msra.mxu2 %v144_v6  ;;  %202 = vmatpush.msra.mxu1 %v143_v9  ;;  %vm271_vm4 = vcmp.gt.f32.partialorder %v269_v60, 0.5  ;;  %s1202_s19 = smov 48   ;;  %s1203_s5 = smov 24  }
  0x25   :  { %172 = vmatpush.msra.mxu0 %v146_v7  ;;  %s1204_s20 = smov 16   ;;  %s1205_s21 = smov [#allocation15]  }
  0x26   :  { %872 = vmatmul.msk.f32.vlgmr.msra.gmra.mxu0 %vm150_vm0, %v136_v8  ;;  %247 = vmatpush.msra.mxu2 %v143_v9  ;;  %s854_s22 = sshll.u32 %s1205_s21, 4  ;;  %s856_s24 = sshll.u32 %s1478_s7, 4  ;;  %s855_s22 = int_to_ptr.vmem [resolvable:$true] %s854_s22  ;;  %s857_s24 = int_to_ptr.hbm [resolvable:$true] %s856_s24 }
  0x27   :  { %203 = vmatpush.msra.mxu1 %v142_v10 }
  0x28   :  { %248 = vmatpush.msra.mxu2 %v142_v10 }
  0x2e   :  { %873 = vmatmul.msk.f32.gmra.mxu0 %vm150_vm0, %v137_v11 }
  0x7a   :  { %v218_v22 = vpop.permute.xlu2 %217 }
  0x93   :  { %v220_v33 = vpop.permute.xlu1 %219 }
  0xa3   :  { %v1292_v12 = vpop.f32.mrf.mxu0 }
  0xa4   :  { %225 = vrot.lane.b32.xlu0 %v1292_v12, %s1192_s11  ;;  %874 = vmatmul.msk.f32.vlgmr.msra.gmra.mxu1 %vm150_vm0, %v1292_v12  ;;  %v223_v24 = vmul.f32 %v218_v22, %v1292_v12  ;;  %v180_v32 = vmul.f32 %v1292_v12, %v138_v4 }
  0xab   :  { %v1298_v13 = vpop.f32.mrf.mxu0 }
  0xac   :  { %227 = vrot.lane.b32.xlu0 %v1298_v13, %s1192_s11  ;;  %875 = vmatmul.msk.f32.gmra.mxu1 %vm150_vm0, %v1298_v13  ;;  %v181_v29 = vmul.f32 %v1298_v13, %v139_v3  ;;  %v224_v35 = vmul.f32 %v220_v33, %v1298_v13 }
 0x116   :  { %v226_v14 = vpop.permute.xlu0 %225 }
 0x117   :  { %876 = vmatmul.msk.f32.vlgmr.msra.gmra.mxu2 %vm150_vm0, %v226_v14 }
 0x11e   :  { %v228_v15 = vpop.permute.xlu0 %227 }
 0x11f   :  { %877 = vmatmul.msk.f32.gmra.mxu2 %vm150_vm0, %v228_v15 }
 0x121   :  { %v205_v23 = vpop.f32.mrf.mxu1 }
 0x122   :  { %v211_v31 = vmul.f32 %v205_v23, %v140_v16 }
 0x124   :  { %v213_v34 = vadd.f32 %v211_v31, %v180_v32 }
 0x129   :  { %v208_v27 = vpop.f32.mrf.mxu1 }
 0x12a   :  { %v212_v28 = vmul.f32 %v208_v27, %v141_v19 }
 0x12c   :  { %v214_v30 = vadd.f32 %v212_v28, %v181_v29 }
 0x19a   :  { %v250_v17 = vpop.f32.mrf.mxu2 }
 0x19b   :  { %v256_v18 = vmul.f32 %v250_v17, %v140_v16 }
 0x19d   :  { %260 = vrot.lane.b32.xlu2 %v256_v18, %s1191_s6 }
 0x1a2   :  { %v253_v20 = vpop.f32.mrf.mxu2 }
 0x1a3   :  { %v257_v21 = vmul.f32 %v253_v20, %v141_v19 }
 0x1a5   :  { %262 = vrot.lane.b32.xlu1 %v257_v21, %s1191_s6 }
 0x1f7   :  { %v261_v25 = vpop.permute.xlu2 %260 }
 0x1f8   :  { %v266_v26 = vadd.f32 %v261_v25, %v223_v24  ;;  %v1348_v24 = vpack.i.bf16 %v1292_v12, %v1298_v13 }
 0x1fa   :  { %274 = vrot.lane.b32.xlu2 %v266_v26, %s1192_s11 }
 0x202   :  { %404 = vrot.lane.b32.xlu2 %v214_v30, %s1193_s12 }
 0x20a   :  { %543 = vrot.lane.b32.xlu2 %v266_v26, %s1194_s13 }
 0x212   :  { %676 = vrot.lane.b32.xlu2 %v213_v34, %s1195_s14 }
 0x217   :  { %v263_v36 = vpop.permute.xlu1 %262 }
 0x218   :  { %v267_v37 = vadd.f32 %v263_v36, %v224_v35 }
 0x21a   :  { %408 = vrot.lane.b32.xlu1 %v267_v37, %s1196_s1  ;;  %276 = vrot.lane.b32.xlu0 %v267_v37, %s1192_s11 }
 0x222   :  { %402 = vrot.lane.b32.xlu1 %v213_v34, %s1193_s12  ;;  %406 = vrot.lane.b32.xlu0 %v266_v26, %s1196_s1 }
 0x22a   :  { %682 = vrot.lane.b32.xlu1 %v267_v37, %s1197_s3  ;;  %545 = vrot.lane.b32.xlu0 %v267_v37, %s1194_s13 }
 0x232   :  { %539 = vrot.lane.b32.xlu1 %v213_v34, %s1198_s15  ;;  %680 = vrot.lane.b32.xlu0 %v266_v26, %s1197_s3 }
 0x23a   :  { %678 = vrot.lane.b32.xlu1 %v214_v30, %s1195_s14  ;;  %541 = vrot.lane.b32.xlu0 %v214_v30, %s1198_s15 }
 0x254   :  { %v275_v38 = vpop.permute.xlu2 %274 }
 0x25c   :  { %v405_v41 = vpop.permute.xlu2 %404 }
 0x264   :  { %v544_v46 = vpop.permute.xlu2 %543 }
 0x26c   :  { %v677_v49 = vpop.permute.xlu2 %676 }
 0x28c   :  { %v409_v39 = vpop.permute.xlu1 %408  ;;  %v277_v40 = vpop.permute.xlu0 %276 }
 0x28d   :  { %878 = vmatpush.xpose.msk.msra.mxu3 %vm278_vm1, %v277_v40  ;;  %884 = vmatpush.xpose.msk.msrb.mxu1 %vm278_vm1, %v409_v39 }
 0x291   :  { %879 = vmatpush.xpose.msk.msra.mxu3 %vm278_vm1, %v275_v38 }
 0x294   :  { %v403_v42 = vpop.permute.xlu1 %402  ;;  %880 = vmatmul.msk.f32.vlgmr.msra.gmra.mxu3 %vm278_vm1, %v213_v34  ;;  %v407_v43 = vpop.permute.xlu0 %406 }
 0x295   :  { %885 = vmatpush.xpose.msk.msrb.mxu1 %vm278_vm1, %v407_v43 }
 0x298   :  { %886 = vmatmul.msk.f32.vlgmr.msrb.gmra.mxu1 %vm278_vm1, %v403_v42 }
 0x29c   :  { %v683_v44 = vpop.permute.xlu1 %682  ;;  %v546_v45 = vpop.permute.xlu0 %545  ;;  %881 = vmatmul.msk.f32.gmra.mxu3 %vm278_vm1, %v214_v30 }
 0x29d   :  { %890 = vmatpush.xpose.msk.msrb.mxu3 %vm278_vm1, %v546_v45  ;;  %896 = vmatpush.xpose.msk.msra.mxu1 %vm278_vm1, %v683_v44 }
 0x2a0   :  { %887 = vmatmul.msk.f32.gmra.mxu1 %vm278_vm1, %v405_v41 }
 0x2a1   :  { %891 = vmatpush.xpose.msk.msrb.mxu3 %vm278_vm1, %v544_v46 }
 0x2a4   :  { %v540_v47 = vpop.permute.xlu1 %539  ;;  %v681_v48 = vpop.permute.xlu0 %680 }
 0x2a5   :  { %892 = vmatmul.msk.f32.vlgmr.msrb.gmra.mxu3 %vm278_vm1, %v540_v47  ;;  %897 = vmatpush.xpose.msk.msra.mxu1 %vm278_vm1, %v681_v48 }
 0x2a8   :  { %898 = vmatmul.msk.f32.vlgmr.msra.gmra.mxu1 %vm278_vm1, %v677_v49 }
 0x2ac   :  { %v542_v50 = vpop.permute.xlu0 %541  ;;  %v679_v51 = vpop.permute.xlu1 %678 }
 0x2ad   :  { %893 = vmatmul.msk.f32.gmra.mxu3 %vm278_vm1, %v542_v50 }
 0x2b0   :  { %899 = vmatmul.msk.f32.gmra.mxu1 %vm278_vm1, %v679_v51 }
 0x315   :  { %v435_v53 = vpop.f32.mrf.mxu1 }
 0x316   :  { %v441_v54 = vmul.f32 0.35355338, %v435_v53 }
 0x317   :  { %v306_v55 = vpop.f32.mrf.mxu3 }
 0x318   :  { %v312_v56 = vmul.f32 0.35355338, %v306_v55  ;;  %v443_v57 = vsel %vm270_vm2, %v441_v54, -999.0 }
 0x319   :  { %v445_v58 = vsel %vm316_vm3, %v443_v57, -inf }
 0x31a   :  { %446 = vmax.xlane.f32.xlu2 %v445_v58  ;;  %v314_v59 = vsel %vm270_vm2, %v312_v56, -999.0 }
 0x31b   :  { %v317_v61 = vsel %vm316_vm3, %v314_v59, -inf }
 0x31c   :  { %318 = vmax.xlane.f32.xlu0 %v317_v61 }
 0x31d   :  { %v438_v62 = vpop.f32.mrf.mxu1 }
 0x31e   :  { %v442_v63 = vmul.f32 0.35355338, %v438_v62 }
 0x31f   :  { %v309_v0 = vpop.f32.mrf.mxu3 }
 0x320   :  { %v313_v1 = vmul.f32 0.35355338, %v309_v0  ;;  %v444_v2 = vsel %vm271_vm4, %v442_v63, -999.0 }
 0x321   :  { %v448_v3 = vsel %vm316_vm3, %v444_v2, -inf }
 0x322   :  { %449 = vmax.xlane.f32.xlu1 %v448_v3  ;;  %v315_v4 = vsel %vm271_vm4, %v313_v1, -999.0 }
 0x323   :  { %v320_v5 = vsel %vm316_vm3, %v315_v4, -inf }
 0x324   :  { %321 = vmax.xlane.f32.xlu2 %v320_v5 }
 0x325   :  { %v709_v6 = vpop.f32.mrf.mxu1 }
 0x326   :  { %v715_v7 = vmul.f32 0.35355338, %v709_v6 }
 0x328   :  { %v572_v8 = vpop.f32.mrf.mxu3  ;;  %v717_v9 = vsel %vm270_vm2, %v715_v7, -999.0 }
 0x329   :  { %v578_v10 = vmul.f32 0.35355338, %v572_v8  ;;  %v719_v11 = vsel %vm316_vm3, %v717_v9, -inf }
 0x32b   :  { %v580_v14 = vsel %vm270_vm2, %v578_v10, -999.0 }
 0x32c   :  { %720 = vmax.xlane.f32.xlu2 %v719_v11  ;;  %v582_v15 = vsel %vm316_vm3, %v580_v14, -inf }
 0x32d   :  { %v712_v16 = vpop.f32.mrf.mxu1  ;;  %583 = vmax.xlane.f32.xlu0 %v582_v15 }
 0x32e   :  { %v716_v17 = vmul.f32 0.35355338, %v712_v16 }
 0x330   :  { %v575_v18 = vpop.f32.mrf.mxu3  ;;  %v718_v19 = vsel %vm271_vm4, %v716_v17, -999.0 }
 0x331   :  { %v579_v20 = vmul.f32 0.35355338, %v575_v18  ;;  %v722_v21 = vsel %vm316_vm3, %v718_v19, -inf }
 0x332   :  { %723 = vmax.xlane.f32.xlu1 %v722_v21 }
 0x333   :  { %v581_v22 = vsel %vm271_vm4, %v579_v20, -999.0 }
 0x334   :  { %v585_v23 = vsel %vm316_vm3, %v581_v22, -inf }
 0x335   :  { %586 = vmax.xlane.f32.xlu2 %v585_v23 }
 0x34d   :  { %929 = vrot.lane.b32.xlu2 %v1348_v24, %s1199_s16 }
 0x38d   :  { %v447_v25 = vpop.xlane.xlu2 %446 }
 0x38e   :  { %v451_v26 = vsub.f32 %v443_v57, %v447_v25 }
 0x38f   :  { %v319_v27 = vpop.xlane.xlu0 %318 }
 0x390   :  { %v453_v28 = vmul.f32 1.442695, %v451_v26  ;;  %v323_v29 = vsub.f32 %v314_v59, %v319_v27 }
 0x392   :  { %948 = vpow2.f32 %v453_v28  ;;  %v325_v30 = vmul.f32 1.442695, %v323_v29 }
 0x394   :  { %950 = vpow2.f32 %v325_v30 }
 0x395   :  { %v450_v31 = vpop.xlane.xlu1 %449 }
 0x396   :  { %v452_v32 = vsub.f32 %v444_v2, %v450_v31 }
 0x397   :  { %v322_v33 = vpop.xlane.xlu2 %321 }
 0x398   :  { %v1351_v34 = vpop.eup %948  ;;  %v455_v35 = vmul.f32 1.442695, %v452_v32  ;;  %v324_v36 = vsub.f32 %v315_v4, %v322_v33 }
 0x399   :  { %v457_v12 = vsel %vm316_vm3, %v1351_v34, 0.0 }
 0x39a   :  { %v1355_v13 = vpop.eup %950  ;;  %952 = vpow2.f32 %v455_v35  ;;  %v327_v37 = vmul.f32 1.442695, %v324_v36  ;;  %458 = vadd.xlane.f32.xlu0 %v457_v12 }
 0x39b   :  { %v329_v38 = vsel %vm316_vm3, %v1355_v13, 0.0 }
 0x39c   :  { %954 = vpow2.f32 %v327_v37  ;;  %330 = vadd.xlane.f32.xlu1 %v329_v38 }
 0x39f   :  { %v721_v39 = vpop.xlane.xlu2 %720 }
 0x3a0   :  { %v1359_v40 = vpop.eup %952  ;;  %v725_v41 = vsub.f32 %v717_v9, %v721_v39  ;;  %v584_v42 = vpop.xlane.xlu0 %583 }
 0x3a1   :  { %v588_v43 = vsub.f32 %v580_v14, %v584_v42  ;;  %v460_v44 = vsel %vm316_vm3, %v1359_v40, 0.0 }
 0x3a2   :  { %v1363_v45 = vpop.eup %954  ;;  %v727_v46 = vmul.f32 1.442695, %v725_v41  ;;  %461 = vadd.xlane.f32.xlu2 %v460_v44 }
 0x3a3   :  { %v590_v47 = vmul.f32 1.442695, %v588_v43  ;;  %v332_v48 = vsel %vm316_vm3, %v1363_v45, 0.0 }
 0x3a4   :  { %956 = vpow2.f32 %v727_v46  ;;  %333 = vadd.xlane.f32.xlu0 %v332_v48 }
 0x3a5   :  { %958 = vpow2.f32 %v590_v47  ;;  %v724_v49 = vpop.xlane.xlu1 %723 }
 0x3a6   :  { %v726_v50 = vsub.f32 %v718_v19, %v724_v49 }
 0x3a8   :  { %v729_v51 = vmul.f32 1.442695, %v726_v50  ;;  %v587_v52 = vpop.xlane.xlu2 %586 }
 0x3a9   :  { %v589_v55 = vsub.f32 %v581_v22, %v587_v52 }
 0x3aa   :  { %v1367_v53 = vpop.eup %956  ;;  %960 = vpow2.f32 %v729_v51 }
 0x3ab   :  { %v1369_v54 = vpop.eup %958  ;;  %v731_v56 = vsel %vm316_vm3, %v1367_v53, 0.0  ;;  %v592_v58 = vmul.f32 1.442695, %v589_v55 }
 0x3ac   :  { %732 = vadd.xlane.f32.xlu1 %v731_v56  ;;  %v594_v57 = vsel %vm316_vm3, %v1369_v54, 0.0 }
 0x3ad   :  { %595 = vadd.xlane.f32.xlu0 %v594_v57  ;;  %962 = vpow2.f32 %v592_v58 }
 0x3b0   :  { %v930_v59 = vpop.permute.xlu2 %929  ;;  %v1375_v60 = vpop.eup %960 }
 0x3b1   :  { %v931_v61 = vunpack.i.l.bf16 %v930_v59  ;;  %v932_v62 = vunpack.i.h.bf16 %v930_v59  ;;  %v734_v63 = vsel %vm316_vm3, %v1375_v60, 0.0 }
 0x3b3   :  { %519 = vmatpush.msrb.mxu2 %v931_v61  ;;  %v1379_v0 = vpop.eup %962 }
 0x3b4   :  { %v597_v1 = vsel %vm316_vm3, %v1379_v0, 0.0 }
 0x3b5   :  { %735 = vadd.xlane.f32.xlu0 %v734_v63  ;;  %520 = vmatpush.msrb.mxu2 %v932_v62 }
 0x3ba   :  { %939 = vrot.lane.b32.xlu2 %v1348_v24, %s1200_s17 }
 0x3bd   :  { %598 = vadd.xlane.f32.xlu0 %v597_v1 }
 0x3c5   :  { %934 = vrot.lane.b32.xlu1 %v1348_v24, %s1201_s18 }
 0x3d1   :  { %944 = vrot.lane.b32.xlu0 %v1348_v24, %s1202_s19 }
 0x40d   :  { %v459_v2 = vpop.xlane.xlu0 %458 }
 0x40e   :  { %964 = vrcp.f32 %v459_v2  ;;  %v474_v9 = vand.u32 2147483648, %v459_v2  ;;  %v472_v11 = vand.u32 2147483647, %v459_v2  ;;  %vm468_vm6 = vweird.f32 %v459_v2 }
 0x40f   :  { %v1386_v7 = vpop.xlane.xlu1 %330 }
 0x410   :  { %v475_v16 = vor.u32 1.1754944e-38, %v474_v9  ;;  %vm473_vm8 = vcmp.eq.f32.partialorder %v472_v11, 8.507059e+37  ;;  %v346_v61 = vand.u32 2147483648, %v1386_v7  ;;  %v344_v1 = vand.u32 2147483647, %v1386_v7 }
 0x412   :  { %v347_v9 = vor.u32 1.1754944e-38, %v346_v61 }
 0x414   :  { %v965_v3 = vpop.eup %964 }
 0x415   :  { %v464_v4 = vmul.f32 %v965_v3, %v459_v2  ;;  %v462_v5 = vpop.xlane.xlu2 %461  ;;  %vm469_vm5 = vweird.f32 %v965_v3 }
 0x416   :  { %966 = vrcp.f32 %v462_v5  ;;  %vm470_vm7 = vmor %vm468_vm6, %vm469_vm5  ;;  %v489_v25 = vand.u32 2147483648, %v462_v5  ;;  %v487_v29 = vand.u32 2147483647, %v462_v5  ;;  %vm483_vm10 = vweird.f32 %v462_v5 }
 0x417   :  { %v465_v6 = vsub.f32 1.0, %v464_v4  ;;  %v1388_v8 = vpop.xlane.xlu0 %333  ;;  %968 = vrcp.f32 %v1386_v7  ;;  %vm340_vm5 = vweird.f32 %v1386_v7 }
 0x418   :  { %v490_v32 = vor.u32 1.1754944e-38, %v489_v25  ;;  %vm488_vm12 = vcmp.eq.f32.partialorder %v487_v29, 8.507059e+37 }
 0x419   :  { %v466_v10 = vmul.f32 %v965_v3, %v465_v6 }
 0x41b   :  { %v467_v14 = vadd.f32 %v965_v3, %v466_v10 }
 0x41c   :  { %v967_v15 = vpop.eup %966 }
 0x41d   :  { %v479_v17 = vmul.f32 %v967_v15, %v462_v5  ;;  %v940_v18 = vpop.permute.xlu2 %939  ;;  %v471_v19 = vsel %vm470_vm7, %v965_v3, %v467_v14  ;;  %vm484_vm9 = vweird.f32 %v967_v15  ;;  %v1395_v30 = vpop.eup %968 }
 0x41e   :  { %v941_v20 = vunpack.i.l.bf16 %v940_v18  ;;  %v476_v21 = vsel %vm473_vm8, %v475_v16, %v471_v19  ;;  %v942_v26 = vunpack.i.h.bf16 %v940_v18  ;;  %vm485_vm11 = vmor %vm483_vm10, %vm484_vm9  ;;  %v336_v33 = vmul.f32 %v1395_v30, %v1386_v7 }
 0x41f   :  { %v480_v22 = vsub.f32 1.0, %v479_v17  ;;  %v733_v23 = vpop.xlane.xlu1 %732  ;;  %v477_v24 = vmul.f32 %v1351_v34, %v476_v21  ;;  %vm341_vm4 = vweird.f32 %v1395_v30  ;;  %vm345_vm9 = vcmp.eq.f32.partialorder %v344_v1, 8.507059e+37 }
 0x420   :  { %970 = vrcp.f32 %v733_v23  ;;  %v1392_v27 = vpop.xlane.xlu0 %595  ;;  %793 = vmatpush.msra.mxu2 %v941_v20  ;;  %v337_v39 = vsub.f32 1.0, %v336_v33  ;;  %v748_v43 = vand.u32 2147483648, %v733_v23  ;;  %v746_v46 = vand.u32 2147483647, %v733_v23  ;;  %vm1418_vm6 = vmor %vm340_vm5, %vm341_vm4 }
 0x421   :  { %v481_v28 = vmul.f32 %v967_v15, %v480_v22  ;;  %888 = vmatmul.msk.f32.vlgmr.msrb.gmra.mxu2 %vm316_vm3, %v477_v24  ;;  %972 = vrcp.f32 %v1388_v8  ;;  %vm742_vm14 = vweird.f32 %v733_v23  ;;  %v361_v22 = vand.u32 2147483648, %v1388_v8 }
 0x422   :  { %794 = vmatpush.msra.mxu2 %v942_v26  ;;  %v338_v47 = vmul.f32 %v1395_v30, %v337_v39  ;;  %v749_v49 = vor.u32 1.1754944e-38, %v748_v43  ;;  %vm747_vm2 = vcmp.eq.f32.partialorder %v746_v46, 8.507059e+37  ;;  %v359_v26 = vand.u32 2147483647, %v1388_v8 }
 0x423   :  { %v482_v31 = vadd.f32 %v967_v15, %v481_v28  ;;  %vm605_vm4 = vweird.f32 %v1392_v27  ;;  %v609_v33 = vand.u32 2147483647, %v1392_v27 }
 0x424   :  { %v339_v56 = vadd.f32 %v1395_v30, %v338_v47 }
 0x425   :  { %v486_v34 = vsel %vm485_vm11, %v967_v15, %v482_v31  ;;  %v362_v31 = vor.u32 1.1754944e-38, %v361_v22 }
 0x426   :  { %v971_v35 = vpop.eup %970  ;;  %v491_v36 = vsel %vm488_vm12, %v490_v32, %v486_v34  ;;  %v343_v7 = vsel %vm1418_vm6, %v1395_v30, %v339_v56  ;;  %vm610_vm6 = vcmp.eq.f32.partialorder %v609_v33, 8.507059e+37  ;;  %v818_v56 = vld [vmem:[#allocation8 + $0x18] sm:$0xff] }
 0x427   :  { %v738_v12 = vmul.f32 %v971_v35, %v733_v23  ;;  %v492_v37 = vmul.f32 %v1359_v40, %v491_v36  ;;  %v1402_v42 = vpop.eup %972  ;;  %vm743_vm13 = vweird.f32 %v971_v35  ;;  %v348_v17 = vsel %vm345_vm9, %v347_v9, %v343_v7  ;;  %837 = vmatpush.msra.mxu3 %v818_v56 }
 0x428   :  { %v736_v38 = vpop.xlane.xlu0 %735  ;;  %v351_v48 = vmul.f32 %v1402_v42, %v1388_v8  ;;  %vm744_vm15 = vmor %vm742_vm14, %vm743_vm13  ;;  %vm356_vm12 = vweird.f32 %v1402_v42  ;;  %vm355_vm13 = vweird.f32 %v1388_v8  ;;  %v349_v25 = vmul.f32 %v1355_v13, %v348_v17 }
 0x429   :  { %v739_v41 = vsub.f32 1.0, %v738_v12  ;;  %974 = vrcp.f32 %v736_v38  ;;  %889 = vmatmul.msk.f32.gmra.mxu2 %vm316_vm3, %v492_v37  ;;  %v763_v2 = vand.u32 2147483648, %v736_v38  ;;  %v761_v5 = vand.u32 2147483647, %v736_v38  ;;  %vm357_vm14 = vmor %vm355_vm13, %vm356_vm12 }
 0x42a   :  { %976 = vrcp.f32 %v1392_v27  ;;  %v352_v57 = vsub.f32 1.0, %v351_v48  ;;  %vm757_vm8 = vweird.f32 %v736_v38  ;;  %v611_v8 = vand.u32 2147483648, %v1392_v27 }
 0x42b   :  { %v740_v44 = vmul.f32 %v971_v35, %v739_v41  ;;  %v764_v11 = vor.u32 1.1754944e-38, %v763_v2  ;;  %vm762_vm11 = vcmp.eq.f32.partialorder %v761_v5, 8.507059e+37 }
 0x42c   :  { %v353_v6 = vmul.f32 %v1402_v42, %v352_v57  ;;  %v817_v57 = vld [vmem:[#allocation8 + $0x10] sm:$0xff] }
 0x42d   :  { %v741_v40 = vadd.f32 %v971_v35, %v740_v44  ;;  %838 = vmatpush.msra.mxu3 %v817_v57 }
 0x42e   :  { %v354_v20 = vadd.f32 %v1402_v42, %v353_v6 }
 0x42f   :  { %v975_v50 = vpop.eup %974  ;;  %v745_v51 = vsel %vm744_vm15, %v971_v35, %v741_v40  ;;  %vm360_vm15 = vcmp.eq.f32.partialorder %v359_v26, 8.507059e+37 }
 0x430   :  { %v750_v52 = vsel %vm747_vm2, %v749_v49, %v745_v51  ;;  %v753_v55 = vmul.f32 %v975_v50, %v736_v38  ;;  %v1410_v58 = vpop.xlane.xlu0 %598  ;;  %v1412_v59 = vpop.eup %976  ;;  %vm758_vm7 = vweird.f32 %v975_v50  ;;  %v358_v30 = vsel %vm357_vm14, %v1402_v42, %v354_v20 }
 0x431   :  { %v751_v63 = vmul.f32 %v1367_v53, %v750_v52  ;;  %978 = vrcp.f32 %v1410_v58  ;;  %v601_v53 = vmul.f32 %v1412_v59, %v1392_v27  ;;  %vm759_vm10 = vmor %vm757_vm8, %vm758_vm7  ;;  %vm606_vm2 = vweird.f32 %v1412_v59 }
 0x432   :  { %v754_v62 = vsub.f32 1.0, %v753_v55  ;;  %vm607_vm5 = vmor %vm605_vm4, %vm606_vm2  ;;  %v612_v38 = vor.u32 1.1754944e-38, %v611_v8  ;;  %v626_v27 = vand.u32 2147483648, %v1410_v58  ;;  %vm620_vm8 = vweird.f32 %v1410_v58 }
 0x433   :  { %900 = vmatmul.msk.f32.vlgmr.msra.gmra.mxu2 %vm316_vm3, %v751_v63  ;;  %v602_v18 = vsub.f32 1.0, %v601_v53  ;;  %v624_v43 = vand.u32 2147483647, %v1410_v58 }
 0x434   :  { %v755_v4 = vmul.f32 %v975_v50, %v754_v62  ;;  %v627_v46 = vor.u32 1.1754944e-38, %v626_v27 }
 0x435   :  { %v603_v28 = vmul.f32 %v1412_v59, %v602_v18 }
 0x436   :  { %v756_v10 = vadd.f32 %v975_v50, %v755_v4 }
 0x437   :  { %v935_v14 = vpop.permute.xlu1 %934  ;;  %v979_v21 = vpop.eup %978  ;;  %v604_v32 = vadd.f32 %v1412_v59, %v603_v28 }
 0x438   :  { %v936_v15 = vunpack.i.l.bf16 %v935_v14  ;;  %v760_v16 = vsel %vm759_vm10, %v975_v50, %v756_v10  ;;  %v937_v23 = vunpack.i.h.bf16 %v935_v14  ;;  %v616_v29 = vmul.f32 %v979_v21, %v1410_v58  ;;  %v816_v58 = vld [vmem:[#allocation8 + $0x8] sm:$0xff] }
 0x439   :  { %v765_v19 = vsel %vm762_vm11, %v764_v11, %v760_v16  ;;  %v608_v12 = vsel %vm607_vm5, %v1412_v59, %v604_v32  ;;  %vm621_vm7 = vweird.f32 %v979_v21  ;;  %vm625_vm10 = vcmp.eq.f32.partialorder %v624_v43, 8.507059e+37  ;;  %v815_v59 = vld [vmem:[#allocation8] sm:$0xff]  ;;  %839 = vmatpush.msra.mxu3 %v816_v58 }
 0x43a   :  { %391 = vmatpush.msrb.mxu0 %v936_v15  ;;  %v766_v24 = vmul.f32 %v1375_v60, %v765_v19  ;;  %v363_v60 = vsel %vm360_vm15, %v362_v31, %v358_v30  ;;  %v617_v13 = vsub.f32 1.0, %v616_v29  ;;  %v613_v41 = vsel %vm610_vm6, %v612_v38, %v608_v12  ;;  %vm622_vm9 = vmor %vm620_vm8, %vm621_vm7 }
 0x43b   :  { %v364_v35 = vmul.f32 %v1363_v45, %v363_v60  ;;  %v614_v45 = vmul.f32 %v1369_v54, %v613_v41  ;;  %840 = vmatpush.msra.mxu3 %v815_v59  ;;  %vm673_vm11 = vcmask 195712  }
 0x43c   :  { %392 = vmatpush.msrb.mxu0 %v937_v23  ;;  %901 = vmatmul.msk.f32.gmra.mxu2 %vm316_vm3, %v766_v24  ;;  %v618_v37 = vmul.f32 %v979_v21, %v617_v13 }
 0x43d   :  { %882 = vmatmul.msk.f32.vlgmr.msrb.gmra.mxu0 %vm316_vm3, %v349_v25 }
 0x43e   :  { %v619_v42 = vadd.f32 %v979_v21, %v618_v37 }
 0x440   :  { %v623_v44 = vsel %vm622_vm9, %v979_v21, %v619_v42 }
 0x441   :  { %v628_v47 = vsel %vm625_vm10, %v627_v46, %v623_v44 }
 0x442   :  { %v629_v48 = vmul.f32 %v1379_v0, %v628_v47 }
 0x443   :  { %v945_v34 = vpop.permute.xlu0 %944 }
 0x444   :  { %v946_v36 = vunpack.i.l.bf16 %v945_v34  ;;  %v947_v39 = vunpack.i.h.bf16 %v945_v34 }
 0x445   :  { %883 = vmatmul.msk.f32.gmra.mxu0 %vm316_vm3, %v364_v35 }
 0x446   :  { %656 = vmatpush.msra.mxu0 %v946_v36 }
 0x448   :  { %657 = vmatpush.msra.mxu0 %v947_v39 }
 0x44d   :  { %894 = vmatmul.msk.f32.vlgmr.msra.gmra.mxu0 %vm316_vm3, %v614_v45 }
 0x455   :  { %895 = vmatmul.msk.f32.gmra.mxu0 %vm316_vm3, %v629_v48  ;;  %vm536_vm3 = vcmask 130112  }
 0x4a4   :  { %v522_v40 = vpop.f32.mrf.mxu2 }
 0x4a5   :  { %530 = vrot.lane.b32.xlu1 %v522_v40, %s1184_s10 }
 0x4ac   :  { %v525_v49 = vpop.f32.mrf.mxu2 }
 0x4b6   :  { %v796_v50 = vpop.f32.mrf.mxu2 }
 0x4b7   :  { %804 = vrot.lane.b32.xlu1 %v796_v50, %s1203_s5 }
 0x4ba   :  { %v394_v54 = vpop.f32.mrf.mxu0 }
 0x4bb   :  { %400 = vst.msk [vmem:[#allocation2] sm:$0xff] %vm278_vm1, %v394_v54 }
 0x4bf   :  { %v799_v51 = vpop.f32.mrf.mxu2 }
 0x4c0   :  { %806 = vrot.lane.b32.xlu0 %v799_v51, %s1203_s5 }
 0x4c2   :  { %v397_v52 = vpop.f32.mrf.mxu0 }
 0x4c3   :  { %401 = vst.msk [vmem:[#allocation2 + $0x8] sm:$0xff] %vm278_vm1, %v397_v52  ;;  %vm810_vm1 = vcmask 261312  }
 0x4ca   :  { %v659_v55 = vpop.f32.mrf.mxu0 }
 0x4cb   :  { %667 = vrot.lane.b32.xlu2 %v659_v55, %s1204_s20 }
 0x4d2   :  { %v662_v0 = vpop.f32.mrf.mxu0 }
 0x4d3   :  { %532 = vrot.lane.b32.xlu2 %v525_v49, %s1184_s10  ;;  %669 = vrot.lane.b32.xlu1 %v662_v0, %s1204_s20 }
 0x517   :  { %v531_v61 = vpop.permute.xlu1 %530 }
 0x518   :  { %537 = vst.msk [vmem:[#allocation2] sm:$0xff] %vm536_vm3, %v531_v61 }
 0x525   :  { %v668_v62 = vpop.permute.xlu2 %667 }
 0x526   :  { %674 = vst.msk [vmem:[#allocation2] sm:$0xff] %vm673_vm11, %v668_v62 }
 0x529   :  { %v805_v63 = vpop.permute.xlu1 %804 }
 0x52a   :  { %811 = vst.msk [vmem:[#allocation2] sm:$0xff] %vm810_vm1, %v805_v63 }
 0x52d   :  { %v533_v1 = vpop.permute.xlu2 %532 }
 0x52e   :  { %538 = vst.msk [vmem:[#allocation2 + $0x8] sm:$0xff] %vm536_vm3, %v533_v1 }
 0x531   :  { %v813_v2 = vld [vmem:[#allocation2] sm:$0xff] }
 0x532   :  { %902 = vmatmul.msk.f32.vlgmr.msra.gmra.mxu3 %vm150_vm0, %v813_v2  ;;  %v807_v4 = vpop.permute.xlu0 %806 }
 0x545   :  { %v670_v3 = vpop.permute.xlu1 %669 }
 0x546   :  { %675 = vst.msk [vmem:[#allocation2 + $0x8] sm:$0xff] %vm673_vm11, %v670_v3 }
 0x547   :  { %812 = vst.msk [vmem:[#allocation2 + $0x8] sm:$0xff] %vm810_vm1, %v807_v4 }
 0x54e   :  { %v814_v5 = vld [vmem:[#allocation2 + $0x8] sm:$0xff] }
 0x54f   :  { %903 = vmatmul.msk.f32.gmra.mxu3 %vm150_vm0, %v814_v5 }
 0x5b5   :  { %v842_v6 = vpop.f32.mrf.mxu3 }
 0x5b6   :  { %848 = vst.msk [vmem:[#allocation15] sm:$0xff] %vm150_vm0, %v842_v6 }
 0x5d2   :  { %v845_v53 = vpop.f32.mrf.mxu3 }
 0x5d3   :  { %849 = vst.msk [vmem:[#allocation15 + $0x8] sm:$0xff] %vm150_vm0, %v845_v53 }
 0x5d4   :  { %862 = dma.vmem_to_hbm [thread:$0]  %s855_s22, 256, %s857_s24, [#allocation5], %s1183_s9, %s1183_s9, %s1184_s10  }
 0x5d5   :  { %1180 = dma.done.wait [#allocation5], 256  }
 0x5d6   :  { %1181 = vsyncadd [#allocation5], 4294967040 }
 0x5d7   :  { %867 = vsyncpa [#allocation4], 1 }
 0x5d8   :  { %868 = vsyncpa [#allocation7], 1 }
 0x5d9   :  { %869 = vsyncpa [#allocation10], 1 }
 0x5da   :  { %870 = vsyncpa [#allocation13], 1 }
 0x5db   :  { %871 = vsyncpa [#allocation5], 1 }

</bundles_post_ra>
